<compile_context>
chip_gen: v7x
topology: tpu7x:2x2x1
jax: 0.10.0
libtpu: 0.0.40
codegen_flags: <defaults>
</compile_context>

<pallas_src>
import functools

import jax
import jax.numpy as jnp
from jax.experimental import pallas as pl
from jax.experimental.pallas import tpu as pltpu

H1 = 512
H2 = 256
H3 = 1
NJ = 2                 # H1 column blocks (lets v7x use both TensorCores)
H1_BLK = H1 // NJ


def _layer1_kernel(x_ref, w1_ref, b1_ref, h1_ref, acc_ref):
    """h1[:, j-block] = LeakyReLU(0.2)(x @ W1[:, j-block] + b1[j-block])."""
    k = pl.program_id(1)

    @pl.when(k == 0)
    def _init():
        acc_ref[...] = jnp.broadcast_to(
            b1_ref[...].astype(jnp.float32), acc_ref.shape)

    # Hot matmul: bf16 operands, f32 accumulation on the MXU.
    acc_ref[...] += jnp.dot(x_ref[...], w1_ref[...],
                            preferred_element_type=jnp.float32)

    @pl.when(k == pl.num_programs(1) - 1)
    def _finalize():
        h1 = acc_ref[...]
        h1_ref[...] = jnp.where(h1 > 0, h1, 0.2 * h1).astype(h1_ref.dtype)


def _epilogue_kernel(h1_ref, w2_ref, b2_ref, w3_ref, b3_ref, out_ref):
    """out = Sigmoid(LeakyReLU(h1 @ W2 + b2) @ W3 + b3). Everything resident."""
    h2 = jnp.dot(h1_ref[...], w2_ref[...],
                 preferred_element_type=jnp.float32) + b2_ref[...]
    h2 = jnp.where(h2 > 0, h2, 0.2 * h2)
    h3 = jnp.dot(h2, w3_ref[...],
                 preferred_element_type=jnp.float32) + b3_ref[...]
    out_ref[...] = jax.nn.sigmoid(h3).astype(out_ref.dtype)


@functools.partial(jax.jit, static_argnames=("tk",))
def global_discriminator(img, w1, b1, w2, b2, w3, b3, *, tk=2048):
    """img: (B, C, H, W) float32. Returns (B, 1) float32."""
    B = img.shape[0]
    x = img.reshape(B, -1)                 # same flatten order as torch.view
    K = x.shape[1]

    # Pad batch to a multiple of 8 (natural (8,128) sublane tiling); slice later.
    Bp = max(8, ((B + 7) // 8) * 8)
    if Bp != B:
        x = jnp.pad(x, ((0, Bp - B), (0, 0)))

    # Large K tiles: cut per-grid-step overhead; pad K so the grid divides evenly.
    tk_eff = min(tk, K)
    nk = -(-K // tk_eff)                   # ceil-divide
    Kp = nk * tk_eff

    # Stream the bandwidth-dominant layer-1 operands in bf16 (halves HBM bytes);
    # accumulate in f32. Zero-padding along K contributes nothing to the sum.
    x_b = x.astype(jnp.bfloat16)
    w1_b = w1.astype(jnp.bfloat16)
    if Kp != K:
        x_b = jnp.pad(x_b, ((0, 0), (0, Kp - K)))
        w1_b = jnp.pad(w1_b, ((0, Kp - K), (0, 0)))

    # ---- Kernel 1: x @ W1 + b1, LeakyReLU --------------------------------
    h1 = pl.pallas_call(
        _layer1_kernel,
        out_shape=jax.ShapeDtypeStruct((Bp, H1), jnp.float32),
        grid_spec=pltpu.PrefetchScalarGridSpec(
            num_scalar_prefetch=0,
            grid=(NJ, nk),                                    # (H1 blocks, K tiles)
            in_specs=[
                pl.BlockSpec((Bp, tk_eff), lambda j, k: (0, k)),       # x K-tile
                pl.BlockSpec((tk_eff, H1_BLK), lambda j, k: (k, j)),   # W1 tile
                pl.BlockSpec((1, H1_BLK), lambda j, k: (0, j)),        # b1 block
            ],
            out_specs=pl.BlockSpec((Bp, H1_BLK), lambda j, k: (0, j)),
            scratch_shapes=[pltpu.VMEM((Bp, H1_BLK), jnp.float32)],
        ),
        compiler_params=pltpu.CompilerParams(
            dimension_semantics=("parallel", "arbitrary"),    # j parallel, K reduce
            vmem_limit_bytes=32 * 1024 * 1024),
    )(x_b, w1_b, b1)

    # ---- Kernel 2: tiny fused epilogue (512 -> 256 -> 1) ------------------
    out = pl.pallas_call(
        _epilogue_kernel,
        out_shape=jax.ShapeDtypeStruct((Bp, H3), jnp.float32),
        grid_spec=pltpu.PrefetchScalarGridSpec(
            num_scalar_prefetch=0,
            grid=(1,),
            in_specs=[
                pl.BlockSpec((Bp, H1), lambda i: (0, 0)),
                pl.BlockSpec((H1, H2), lambda i: (0, 0)),
                pl.BlockSpec((1, H2), lambda i: (0, 0)),
                pl.BlockSpec((H2, H3), lambda i: (0, 0)),
                pl.BlockSpec((1, H3), lambda i: (0, 0)),
            ],
            out_specs=pl.BlockSpec((Bp, H3), lambda i: (0, 0)),
        ),
        compiler_params=pltpu.CompilerParams(
            dimension_semantics=("arbitrary",)),
    )(h1, w2, b2, w3, b3)

    return out[:B]


def _reference(img, w1, b1, w2, b2, w3, b3):
    # Matches the kernel's numerics: bf16 layer-1 operands, f32 accumulation.
    x = img.reshape(img.shape[0], -1)
    h1 = jnp.dot(x.astype(jnp.bfloat16), w1.astype(jnp.bfloat16),
                 preferred_element_type=jnp.float32) + b1
    h1 = jnp.where(h1 > 0, h1, 0.2 * h1)
    h2 = h1 @ w2 + b2
    h2 = jnp.where(h2 > 0, h2, 0.2 * h2)
    h3 = h2 @ w3 + b3
    return jax.nn.sigmoid(h3)


def _init_linear(key, fan_in, fan_out):
    # PyTorch default Linear init: U(-1/sqrt(fan_in), +1/sqrt(fan_in)).
    kw, kb = jax.random.split(key)
    bound = 1.0 / jnp.sqrt(jnp.float32(fan_in))
    w = jax.random.uniform(kw, (fan_in, fan_out), jnp.float32, -bound, bound)
    b = jax.random.uniform(kb, (1, fan_out), jnp.float32, -bound, bound)
    return w, b


if __name__ == "__main__":
    # Small shapes consistent with the module: the real module uses (3, 256, 256);
    # here spatial is shrunk to 16 so K = 3*16*16 = 768. Hidden dims are exact.
    B, C, Hs, Ws = 2, 3, 16, 16
    K = C * Hs * Ws

    key = jax.random.PRNGKey(0)
    k_img, k1, k2, k3 = jax.random.split(key, 4)

    img = jax.random.normal(k_img, (B, C, Hs, Ws), jnp.float32)
    w1, b1 = _init_linear(k1, K, H1)
    w2, b2 = _init_linear(k2, H1, H2)
    w3, b3 = _init_linear(k3, H2, H3)

    ref = _reference(img, w1, b1, w2, b2, w3, b3)

    # Exercise both the multi-K-tile accumulation path and the default big tile.
    out_small_tile = jax.block_until_ready(
        global_discriminator(img, w1, b1, w2, b2, w3, b3, tk=256))
    out_default = jax.block_until_ready(
        global_discriminator(img, w1, b1, w2, b2, w3, b3))

    assert out_default.shape == (B, 1)
    assert jnp.allclose(out_small_tile, ref, atol=2e-3, rtol=2e-3), (out_small_tile, ref)
    assert jnp.allclose(out_default, ref, atol=2e-3, rtol=2e-3), (out_default, ref)
    print("KERNEL_OK")
</pallas_src>

<mosaic_0001>
module attributes {stable_mosaic.version = 11 : i64} {
  func.func @_epilogue_kernel(%arg0: i32, %arg1: memref<8x512xf32, #tpu.memory_space<vmem>>, %arg2: memref<512x256xf32, #tpu.memory_space<vmem>>, %arg3: memref<1x256xf32, #tpu.memory_space<vmem>>, %arg4: memref<256x1xf32, #tpu.memory_space<vmem>>, %arg5: memref<1x1xf32, #tpu.memory_space<vmem>>, %arg6: memref<8x1xf32, #tpu.memory_space<vmem>>) attributes {dimension_semantics = [#tpu.dimension_semantics<arbitrary>], iteration_bounds = array<i64: 1>, scalar_prefetch = 0 : i64, scratch_operands = 0 : i64, tpu.core_type = #tpu.core_type<tc>, window_params = [{pipeline_mode = #tpu.pipeline_mode<synchronous>, transform_indices = @transform_0, window_bounds = array<i64: 8, 512>}, {pipeline_mode = #tpu.pipeline_mode<synchronous>, transform_indices = @transform_1, window_bounds = array<i64: 512, 256>}, {pipeline_mode = #tpu.pipeline_mode<synchronous>, transform_indices = @transform_2, window_bounds = array<i64: 1, 256>}, {pipeline_mode = #tpu.pipeline_mode<synchronous>, transform_indices = @transform_3, window_bounds = array<i64: 256, 1>}, {pipeline_mode = #tpu.pipeline_mode<synchronous>, transform_indices = @transform_4, window_bounds = array<i64: 1, 1>}, {pipeline_mode = #tpu.pipeline_mode<synchronous>, transform_indices = @transform_5, window_bounds = array<i64: 8, 1>}]} {
    %c0 = arith.constant 0 : index
    %c0_0 = arith.constant 0 : index
    %0 = vector.load %arg1[%c0, %c0_0] : memref<8x512xf32, #tpu.memory_space<vmem>>, vector<8x512xf32>
    %c0_1 = arith.constant 0 : index
    %c0_2 = arith.constant 0 : index
    %1 = vector.load %arg2[%c0_1, %c0_2] : memref<512x256xf32, #tpu.memory_space<vmem>>, vector<512x256xf32>
    %cst = arith.constant dense<0.000000e+00> : vector<8x256xf32>
    %2 = tpu.matmul %0, %1, %cst {dimension_numbers = #tpu.dot_dimension_numbers<[1], [0], [0], [1], [0, 0, 1, 1], [], []>} : vector<8x512xf32>, vector<512x256xf32>, vector<8x256xf32> -> vector<8x256xf32>
    %c0_3 = arith.constant 0 : index
    %c0_4 = arith.constant 0 : index
    %3 = vector.load %arg3[%c0_3, %c0_4] : memref<1x256xf32, #tpu.memory_space<vmem>>, vector<1x256xf32>
    %4 = vector.broadcast %3 : vector<1x256xf32> to vector<8x256xf32>
    %5 = arith.addf %2, %4 : vector<8x256xf32>
    %cst_5 = arith.constant 0.000000e+00 : f32
    %6 = vector.broadcast %cst_5 : f32 to vector<8x256xf32>
    %7 = arith.cmpf ogt, %5, %6 : vector<8x256xf32>
    %cst_6 = arith.constant 2.000000e-01 : f32
    %8 = vector.broadcast %cst_6 : f32 to vector<8x256xf32>
    %9 = arith.mulf %8, %5 : vector<8x256xf32>
    %10 = arith.select %7, %5, %9 : vector<8x256xi1>, vector<8x256xf32>
    %c0_7 = arith.constant 0 : index
    %c0_8 = arith.constant 0 : index
    %11 = vector.load %arg4[%c0_7, %c0_8] : memref<256x1xf32, #tpu.memory_space<vmem>>, vector<256x1xf32>
    %cst_9 = arith.constant dense<0.000000e+00> : vector<8x1xf32>
    %12 = tpu.matmul %10, %11, %cst_9 {dimension_numbers = #tpu.dot_dimension_numbers<[1], [0], [0], [1], [0, 0, 1, 1], [], []>} : vector<8x256xf32>, vector<256x1xf32>, vector<8x1xf32> -> vector<8x1xf32>
    %c0_10 = arith.constant 0 : index
    %c0_11 = arith.constant 0 : index
    %13 = vector.load %arg5[%c0_10, %c0_11] : memref<1x1xf32, #tpu.memory_space<vmem>>, vector<1x1xf32>
    %14 = vector.broadcast %13 : vector<1x1xf32> to vector<8x1xf32>
    %15 = arith.addf %12, %14 : vector<8x1xf32>
    %16 = arith.negf %15 : vector<8x1xf32>
    %17 = math.exp %16 : vector<8x1xf32>
    %cst_12 = arith.constant 1.000000e+00 : f32
    %18 = vector.broadcast %cst_12 : f32 to vector<8x1xf32>
    %19 = arith.addf %18, %17 : vector<8x1xf32>
    %20 = arith.divf %18, %19 : vector<8x1xf32>
    %c0_13 = arith.constant 0 : index
    %c0_14 = arith.constant 0 : index
    %21 = vector.load %arg6[%c0_13, %c0_14] : memref<8x1xf32, #tpu.memory_space<vmem>>, vector<8x1xf32>
    tpu.vector_store %arg6[%c0_13, %c0_14], %20 {strides = array<i32>} : memref<8x1xf32, #tpu.memory_space<vmem>>, vector<8x1xf32>,
    return
  }
  func.func @transform_0(%arg0: i32) -> (i32, i32) {
    %c0_i32 = arith.constant 0 : i32
    %c0_i32_0 = arith.constant 0 : i32
    %c0_i32_1 = arith.constant 0 : i32
    return %c0_i32, %c0_i32_0 : i32, i32
  }
  func.func @transform_1(%arg0: i32) -> (i32, i32) {
    %c0_i32 = arith.constant 0 : i32
    %c0_i32_0 = arith.constant 0 : i32
    %c0_i32_1 = arith.constant 0 : i32
    return %c0_i32, %c0_i32_0 : i32, i32
  }
  func.func @transform_2(%arg0: i32) -> (i32, i32) {
    %c0_i32 = arith.constant 0 : i32
    %c0_i32_0 = arith.constant 0 : i32
    %c0_i32_1 = arith.constant 0 : i32
    return %c0_i32, %c0_i32_0 : i32, i32
  }
  func.func @transform_3(%arg0: i32) -> (i32, i32) {
    %c0_i32 = arith.constant 0 : i32
    %c0_i32_0 = arith.constant 0 : i32
    %c0_i32_1 = arith.constant 0 : i32
    return %c0_i32, %c0_i32_0 : i32, i32
  }
  func.func @transform_4(%arg0: i32) -> (i32, i32) {
    %c0_i32 = arith.constant 0 : i32
    %c0_i32_0 = arith.constant 0 : i32
    %c0_i32_1 = arith.constant 0 : i32
    return %c0_i32, %c0_i32_0 : i32, i32
  }
  func.func @transform_5(%arg0: i32) -> (i32, i32) {
    %c0_i32 = arith.constant 0 : i32
    %c0_i32_0 = arith.constant 0 : i32
    %c0_i32_1 = arith.constant 0 : i32
    return %c0_i32, %c0_i32_0 : i32, i32
  }
}

module attributes {stable_mosaic.version = 11 : i64} {
  func.func @_layer1_kernel(%arg0: i32, %arg1: i32, %arg2: memref<8x256xbf16, #tpu.memory_space<vmem>>, %arg3: memref<256x256xbf16, #tpu.memory_space<vmem>>, %arg4: memref<1x256xf32, #tpu.memory_space<vmem>>, %arg5: memref<8x256xf32, #tpu.memory_space<vmem>>, %arg6: memref<8x256xf32, #tpu.memory_space<vmem>>) attributes {dimension_semantics = [#tpu.dimension_semantics<parallel>, #tpu.dimension_semantics<arbitrary>], iteration_bounds = array<i64: 2, 3>, scalar_prefetch = 0 : i64, scratch_operands = 1 : i64, tpu.core_type = #tpu.core_type<tc>, window_params = [{transform_indices = @transform_0, window_bounds = array<i64: 8, 256>}, {transform_indices = @transform_1, window_bounds = array<i64: 256, 256>}, {transform_indices = @transform_2, window_bounds = array<i64: 1, 256>}, {transform_indices = @transform_3, window_bounds = array<i64: 8, 256>}]} {
    %c0_i32 = arith.constant 0 : i32
    %0 = arith.cmpi eq, %arg1, %c0_i32 : i32
    %1 = arith.extui %0 : i1 to i32
    %c0_i32_0 = arith.constant 0 : i32
    %2 = arith.cmpi ne, %1, %c0_i32_0 : i32
    scf.if %2 {
      %c0_9 = arith.constant 0 : index
      %c0_10 = arith.constant 0 : index
      %12 = vector.load %arg4[%c0_9, %c0_10] : memref<1x256xf32, #tpu.memory_space<vmem>>, vector<1x256xf32>
      %13 = vector.shape_cast %12 : vector<1x256xf32> to vector<1x256xf32>
      %14 = vector.broadcast %13 : vector<1x256xf32> to vector<8x256xf32>
      %c0_11 = arith.constant 0 : index
      %c0_12 = arith.constant 0 : index
      %15 = vector.load %arg6[%c0_11, %c0_12] : memref<8x256xf32, #tpu.memory_space<vmem>>, vector<8x256xf32>
      tpu.vector_store %arg6[%c0_11, %c0_12], %14 {strides = array<i32>} : memref<8x256xf32, #tpu.memory_space<vmem>>, vector<8x256xf32>,
    } else {
    }
    %c0 = arith.constant 0 : index
    %c0_1 = arith.constant 0 : index
    %3 = vector.load %arg6[%c0, %c0_1] : memref<8x256xf32, #tpu.memory_space<vmem>>, vector<8x256xf32>
    %c0_2 = arith.constant 0 : index
    %c0_3 = arith.constant 0 : index
    %4 = vector.load %arg2[%c0_2, %c0_3] : memref<8x256xbf16, #tpu.memory_space<vmem>>, vector<8x256xbf16>
    %c0_4 = arith.constant 0 : index
    %c0_5 = arith.constant 0 : index
    %5 = vector.load %arg3[%c0_4, %c0_5] : memref<256x256xbf16, #tpu.memory_space<vmem>>, vector<256x256xbf16>
    %cst = arith.constant dense<0.000000e+00> : vector<8x256xf32>
    %6 = tpu.matmul %4, %5, %cst {dimension_numbers = #tpu.dot_dimension_numbers<[1], [0], [0], [1], [0, 0, 1, 1], [], []>} : vector<8x256xbf16>, vector<256x256xbf16>, vector<8x256xf32> -> vector<8x256xf32>
    %7 = arith.addf %3, %6 : vector<8x256xf32>
    %c0_6 = arith.constant 0 : index
    %c0_7 = arith.constant 0 : index
    %8 = vector.load %arg6[%c0_6, %c0_7] : memref<8x256xf32, #tpu.memory_space<vmem>>, vector<8x256xf32>
    tpu.vector_store %arg6[%c0_6, %c0_7], %7 {strides = array<i32>} : memref<8x256xf32, #tpu.memory_space<vmem>>, vector<8x256xf32>,
    %c2_i32 = arith.constant 2 : i32
    %9 = arith.cmpi eq, %arg1, %c2_i32 : i32
    %10 = arith.extui %9 : i1 to i32
    %c0_i32_8 = arith.constant 0 : i32
    %11 = arith.cmpi ne, %10, %c0_i32_8 : i32
    scf.if %11 {
      %c0_9 = arith.constant 0 : index
      %c0_10 = arith.constant 0 : index
      %12 = vector.load %arg6[%c0_9, %c0_10] : memref<8x256xf32, #tpu.memory_space<vmem>>, vector<8x256xf32>
      %cst_11 = arith.constant 0.000000e+00 : f32
      %13 = vector.broadcast %cst_11 : f32 to vector<8x256xf32>
      %14 = arith.cmpf ogt, %12, %13 : vector<8x256xf32>
      %cst_12 = arith.constant 2.000000e-01 : f32
      %15 = vector.broadcast %cst_12 : f32 to vector<8x256xf32>
      %16 = arith.mulf %15, %12 : vector<8x256xf32>
      %17 = arith.select %14, %12, %16 : vector<8x256xi1>, vector<8x256xf32>
      %c0_13 = arith.constant 0 : index
      %c0_14 = arith.constant 0 : index
      %18 = vector.load %arg5[%c0_13, %c0_14] : memref<8x256xf32, #tpu.memory_space<vmem>>, vector<8x256xf32>
      tpu.vector_store %arg5[%c0_13, %c0_14], %17 {strides = array<i32>} : memref<8x256xf32, #tpu.memory_space<vmem>>, vector<8x256xf32>,
    } else {
    }
    return
  }
  func.func @transform_0(%arg0: i32, %arg1: i32) -> (i32, i32) {
    %c0_i32 = arith.constant 0 : i32
    %c0_i32_0 = arith.constant 0 : i32
    return %c0_i32, %arg1 : i32, i32
  }
  func.func @transform_1(%arg0: i32, %arg1: i32) -> (i32, i32) {
    %c0_i32 = arith.constant 0 : i32
    return %arg1, %arg0 : i32, i32
  }
  func.func @transform_2(%arg0: i32, %arg1: i32) -> (i32, i32) {
    %c0_i32 = arith.constant 0 : i32
    %c0_i32_0 = arith.constant 0 : i32
    return %c0_i32, %arg0 : i32, i32
  }
  func.func @transform_3(%arg0: i32, %arg1: i32) -> (i32, i32) {
    %c0_i32 = arith.constant 0 : i32
    %c0_i32_0 = arith.constant 0 : i32
    return %c0_i32, %arg0 : i32, i32
  }
}

</mosaic_0001>

<bundles_post_ra>
// kernel: global_discriminator.2
= control target key start
LH: loop header
LB: loop body
LE: loop exit
PB: predicated region body
PF: predicated region fallthrough
CT: control target
= control target key end

     0   :  { %s1005_s12 = smov 0   ;;  %s1007_s13 = smov 0   ;;  %s1211_s0 = inlined_call_operand.vmem [shape: bf16[8,768], index: 0, kind: input, shape index: {}]   ;;  %s1212_s1 = inlined_call_operand.vmem [shape: bf16[768,512], index: 1, kind: input, shape index: {}]   ;;  %s1213_s2 = inlined_call_operand.vmem [shape: f32[1,512], index: 2, kind: input, shape index: {}]   ;;  %s1214_s3 = inlined_call_operand.vmem [shape: f32[8,512], index: 3, kind: output, shape index: {}]  }
   0x1   :  { %s1009_s14 = smov 0   ;;  %s1011_s15 = smov 0  }
   0x2   :  { %s1013_s16 = smov 0   ;;  %s1015_s17 = smov 0  }
   0x3   :  { %s1017_s18 = smov 0  }
   0x4 LB: > { %s22_s19 = sadd.s32 1, %s975_s16  ;;  %s25_s20 = sadd.s32 1, %s979_s17  ;;  %s983_s18 = sphi %s1017_s18, %s13_s18   ;;  %s979_s17 = sphi %s1015_s17, %s1220_s17   ;;  %s975_s16 = sphi %s1013_s16, %s1219_s16   ;;  %s971_s15 = sphi %s1011_s15, %s1218_s15   ;;  %s967_s14 = sphi %s1009_s14, %s1217_s14   ;;  %s963_s13 = sphi %s1007_s13, %s1216_s13   ;;  %s959_s12 = sphi %s1005_s12, %s1215_s12  }
   0x5   : > { %p23_p0 = scmp.ge.s32.totalorder %s22_s19, 3  ;;  %p67_p1 = scmp.ne.s32.totalorder %s963_s13, %s959_s12 }
   0x6   : > { %p68_p2 = scmp.eq.s32.totalorder %s983_s18, 0  ;;  %s60_s24 = sadd.s32 1, %s963_s13 }
   0x7   : > { %s1222_s19 = smov (%p23_p0, %s22_s19), 0  ;;  %s1224_s20 = smov (!%p23_p0, %s25_s20), %s979_s17 }
   0x8   : > { %p69_p3 = por %p68_p2, %p67_p1  ;;  %p27_p4 = scmp.ge.s32.totalorder %s1224_s20, 2 }
   0x9   : > { %s55_s21 = ssub.s32 %s975_s16, %s1222_s19  ;;  %p771_p6 = scmp.ge.s32.totalorder %s983_s18, 6 }
   0xa   : > { %s1226_s20 = smov (%p27_p4, %s1224_s20), 0 }
   0xb   : > { %s56_s22 = ssub.s32 %s979_s17, %s1226_s20  ;;  %145 = sbr.rel (%p771_p6) target bundleno = 41 (0x29), region = 16 }
   0xc   : > { %s57_s23 = sor.u32 %s56_s22, %s55_s21 }
   0xd   : > { %p58_p5 = scmp.eq.s32.totalorder %s57_s23, 0 }
   0xf   : > { %s1056_s25 = scalar_select %p58_p5, %s963_s13, %s60_s24  }
  0x12   : > { %157 = sbr.rel (!%p69_p3) target bundleno = 41 (0x29), region = 24  ;;  %s159_s26 = sand.u32 (%p69_p3), 1, %s963_s13  }
  0x13   : > { %s774_s27 = sshll.u32 (%p69_p3), %s979_s17, 1  ;;  %s772_s28 = sshll.u32 (%p69_p3), %s159_s26, 8 }
  0x14   : > { %s822_s29 = sshll.u32 (%p69_p3), %s975_s16, 7  ;;  %s1070_s8 = scalar_lea.vmem (%p69_p3), [#allocation3], %s772_s28 }
  0x15   : > { %s165_s30 = sadd.s32 (%p69_p3), %s822_s29, %s774_s27 }
  0x16   : > { %s776_s4 = sshll.u32 (%p69_p3), %s165_s30, 2 }
  0x17   : > { %s1065_s7 = scalar_lea.vmem (%p69_p3), %s1212_s1, %s776_s4 }
  0x18   : > { %v257_v0 = vld [vmem:[%s1065_s7] sm:$0xff] (%p69_p3)  ;;  %v259_v1 = vld [vmem:[%s1065_s7 + $0x10] sm:$0xff] (%p69_p3) }
  0x19   : > { %v261_v2 = vld [vmem:[%s1065_s7 + $0x20] sm:$0xff]  ;;  %258 = vst [vmem:[%s1070_s8] sm:$0xff] %v257_v0  ;;  %260 = vst [vmem:[%s1070_s8 + $0x8] sm:$0xff] %v259_v1  ;;  %v263_v3 = vld [vmem:[%s1065_s7 + $0x30] sm:$0xff] }
  0x1a   : > { %262 = vst [vmem:[%s1070_s8 + $0x10] sm:$0xff] %v261_v2  ;;  %v265_v4 = vld [vmem:[%s1065_s7 + $0x40] sm:$0xff]  ;;  %v267_v5 = vld [vmem:[%s1065_s7 + $0x50] sm:$0xff]  ;;  %264 = vst [vmem:[%s1070_s8 + $0x18] sm:$0xff] %v263_v3 }
  0x1b   : > { %266 = vst [vmem:[%s1070_s8 + $0x20] sm:$0xff] %v265_v4  ;;  %268 = vst [vmem:[%s1070_s8 + $0x28] sm:$0xff] %v267_v5  ;;  %v269_v6 = vld [vmem:[%s1065_s7 + $0x60] sm:$0xff]  ;;  %v271_v7 = vld [vmem:[%s1065_s7 + $0x70] sm:$0xff] }
  0x1c   : > { %v273_v8 = vld [vmem:[%s1065_s7 + $0x80] sm:$0xff]  ;;  %270 = vst [vmem:[%s1070_s8 + $0x30] sm:$0xff] %v269_v6  ;;  %272 = vst [vmem:[%s1070_s8 + $0x38] sm:$0xff] %v271_v7  ;;  %v275_v9 = vld [vmem:[%s1065_s7 + $0x90] sm:$0xff] }
  0x1d   : > { %274 = vst [vmem:[%s1070_s8 + $0x40] sm:$0xff] %v273_v8  ;;  %v277_v10 = vld [vmem:[%s1065_s7 + $0xa0] sm:$0xff]  ;;  %v279_v11 = vld [vmem:[%s1065_s7 + $0xb0] sm:$0xff]  ;;  %276 = vst [vmem:[%s1070_s8 + $0x48] sm:$0xff] %v275_v9 }
  0x1e   : > { %278 = vst [vmem:[%s1070_s8 + $0x50] sm:$0xff] %v277_v10  ;;  %280 = vst [vmem:[%s1070_s8 + $0x58] sm:$0xff] %v279_v11  ;;  %v281_v12 = vld [vmem:[%s1065_s7 + $0xc0] sm:$0xff]  ;;  %v283_v13 = vld [vmem:[%s1065_s7 + $0xd0] sm:$0xff] }
  0x1f   : > { %v285_v14 = vld [vmem:[%s1065_s7 + $0xe0] sm:$0xff]  ;;  %282 = vst [vmem:[%s1070_s8 + $0x60] sm:$0xff] %v281_v12  ;;  %284 = vst [vmem:[%s1070_s8 + $0x68] sm:$0xff] %v283_v13  ;;  %v287_v15 = vld [vmem:[%s1065_s7 + $0xf0] sm:$0xff] }
  0x20   : > { %286 = vst [vmem:[%s1070_s8 + $0x70] sm:$0xff] %v285_v14  ;;  %v289_v16 = vld [vmem:[%s1065_s7 + $0x100] sm:$0xff]  ;;  %v291_v17 = vld [vmem:[%s1065_s7 + $0x110] sm:$0xff]  ;;  %288 = vst [vmem:[%s1070_s8 + $0x78] sm:$0xff] %v287_v15 }
  0x21   : > { %290 = vst [vmem:[%s1070_s8 + $0x80] sm:$0xff] %v289_v16  ;;  %292 = vst [vmem:[%s1070_s8 + $0x88] sm:$0xff] %v291_v17  ;;  %v293_v18 = vld [vmem:[%s1065_s7 + $0x120] sm:$0xff]  ;;  %v295_v19 = vld [vmem:[%s1065_s7 + $0x130] sm:$0xff] }
  0x22   : > { %v297_v20 = vld [vmem:[%s1065_s7 + $0x140] sm:$0xff]  ;;  %294 = vst [vmem:[%s1070_s8 + $0x90] sm:$0xff] %v293_v18  ;;  %296 = vst [vmem:[%s1070_s8 + $0x98] sm:$0xff] %v295_v19  ;;  %v299_v21 = vld [vmem:[%s1065_s7 + $0x150] sm:$0xff] }
  0x23   : > { %298 = vst [vmem:[%s1070_s8 + $0xa0] sm:$0xff] %v297_v20  ;;  %v301_v22 = vld [vmem:[%s1065_s7 + $0x160] sm:$0xff]  ;;  %v303_v23 = vld [vmem:[%s1065_s7 + $0x170] sm:$0xff]  ;;  %300 = vst [vmem:[%s1070_s8 + $0xa8] sm:$0xff] %v299_v21 }
  0x24   : > { %302 = vst [vmem:[%s1070_s8 + $0xb0] sm:$0xff] %v301_v22  ;;  %304 = vst [vmem:[%s1070_s8 + $0xb8] sm:$0xff] %v303_v23  ;;  %v305_v24 = vld [vmem:[%s1065_s7 + $0x180] sm:$0xff]  ;;  %v307_v25 = vld [vmem:[%s1065_s7 + $0x190] sm:$0xff] }
  0x25   : > { %v309_v26 = vld [vmem:[%s1065_s7 + $0x1a0] sm:$0xff]  ;;  %306 = vst [vmem:[%s1070_s8 + $0xc0] sm:$0xff] %v305_v24  ;;  %308 = vst [vmem:[%s1070_s8 + $0xc8] sm:$0xff] %v307_v25  ;;  %v311_v27 = vld [vmem:[%s1065_s7 + $0x1b0] sm:$0xff] }
  0x26   : > { %310 = vst [vmem:[%s1070_s8 + $0xd0] sm:$0xff] %v309_v26  ;;  %v313_v28 = vld [vmem:[%s1065_s7 + $0x1c0] sm:$0xff]  ;;  %v315_v29 = vld [vmem:[%s1065_s7 + $0x1d0] sm:$0xff]  ;;  %312 = vst [vmem:[%s1070_s8 + $0xd8] sm:$0xff] %v311_v27 }
  0x27   : > { %314 = vst [vmem:[%s1070_s8 + $0xe0] sm:$0xff] %v313_v28  ;;  %316 = vst [vmem:[%s1070_s8 + $0xe8] sm:$0xff] %v315_v29  ;;  %v317_v30 = vld [vmem:[%s1065_s7 + $0x1e0] sm:$0xff]  ;;  %v319_v31 = vld [vmem:[%s1065_s7 + $0x1f0] sm:$0xff] }
  0x28   : > { %318 = vst [vmem:[%s1070_s8 + $0xf0] sm:$0xff] %v317_v30  ;;  %320 = vst [vmem:[%s1070_s8 + $0xf8] sm:$0xff] %v319_v31 }
  0x29 PF: > { %p777_p7 = scmp.ge.s32.totalorder %s983_s18, 1  ;;  %p333_p8 = scmp.lt.s32.totalorder %s983_s18, 7 }
  0x2b   : > { %p334_p9 = pnand %p777_p7, %p333_p8 }
  0x2c   : > { %s340_s9 = sand.u32 (!%p334_p9), 1, %s959_s12   ;;  %s779_s10 = sshll.u32 (!%p334_p9), %s967_s14, 1 }
  0x2d   : > { %337 = sbr.rel (%p334_p9) target bundleno = 354 (0x162), region = 66  ;;  %s778_s11 = sshll.u32 (!%p334_p9), %s340_s9, 8 }
  0x2e   : > { %p373_p10 = scmp.lt.s32.totalorder (!%p334_p9), %s779_s10, 5  ;;  %s781_s21 = sshll.u32 (!%p334_p9), %s971_s15, 1 }
  0x2f   : > { %p381_p11 = scmp.lt.s32.totalorder (!%p334_p9), %s781_s21, 3  ;;  %s1151_s15 = scalar_lea.vmem (!%p334_p9), [#allocation3], %s778_s11 }
  0x30   : > { %p784_p12 = scmp.ne.s32.totalorder (!%p334_p9), %s967_s14, 0 }
  0x34   : > { %s1228_s10 = smov (!%p373_p10, %s779_s10), 5  ;;  %s1230_s21 = smov (!%p381_p11, %s781_s21), 3 }
  0x35   : > { %s780_s22 = sshll.u32 %s1228_s10, 2  ;;  %s383_s29 = scalar_lea.vmem %s1213_s2, %s1230_s21  ;;  %v397_v32 = vlaneseq (!%p784_p12) }
  0x36   : > { %s1141_s26 = scalar_lea.vmem %s1211_s0, %s780_s22  ;;  %s783_s30 = sshll.u32 %s1230_s21, 3  ;;  %v395_v34 = vld [vmem:[%s383_s29] sm:$0x3] (!%p784_p12) }
  0x37   : > { %s1149_s5 = scalar_lea.vmem %s1214_s3, %s783_s30  ;;  %394 = sbr.rel (%p784_p12) target bundleno = 62 (0x3e), region = 74  ;;  %v398_v33 = vshrl.u32 (!%p784_p12), %v397_v32, 7 }
  0x39   : > { %v399_v35 = vsub.s32 (!%p784_p12), 0, %v398_v33  ;;  %v403_v36 = vsub.s32 (!%p784_p12), 1, %v398_v33 }
  0x3b   : > { %v400_v37 = vrot.slane (!%p784_p12), %v395_v34, %v399_v35  ;;  %v404_v38 = vrot.slane (!%p784_p12), %v395_v34, %v403_v36 }
  0x3d   : > { %407 = vst [vmem:[#allocation2] sm:$0xff] (!%p784_p12), %v400_v37  ;;  %408 = vst [vmem:[#allocation2 + $0x8] sm:$0xff] (!%p784_p12), %v404_v38 }
  0x3e PF: > { %v879_v39 = vld [vmem:[%s1151_s15 + $0x4] ss:$8 sps:$4 sm:$0xff]   ;;  %v881_v40 = vld [vmem:[%s1151_s15] ss:$8 sps:$4 sm:$0xff]   ;;  %v882_v41 = vld [vmem:[%s1151_s15 + $0x14] ss:$8 sps:$4 sm:$0xff]  }
  0x3f   : > { %611 = vmatprep.subr.bf16.mxu0 %v879_v39  ;;  %v884_v42 = vld [vmem:[%s1151_s15 + $0x10] ss:$8 sps:$4 sm:$0xff]   ;;  %v885_v43 = vld [vmem:[%s1151_s15 + $0x24] ss:$8 sps:$4 sm:$0xff]   ;;  %v887_v44 = vld [vmem:[%s1151_s15 + $0x20] ss:$8 sps:$4 sm:$0xff]  }
  0x40   : > { %612 = vmatpush1.bf16.msra.mxu0 %v881_v40  ;;  %v888_v45 = vld [vmem:[%s1151_s15 + $0x34] ss:$8 sps:$4 sm:$0xff]   ;;  %v890_v46 = vld [vmem:[%s1151_s15 + $0x30] ss:$8 sps:$4 sm:$0xff]   ;;  %v891_v47 = vld [vmem:[%s1151_s15 + $0x44] ss:$8 sps:$4 sm:$0xff]  }
  0x41   : > { %613 = vmatprep.subr.bf16.mxu0 %v882_v41  ;;  %v893_v48 = vld [vmem:[%s1151_s15 + $0x40] ss:$8 sps:$4 sm:$0xff]   ;;  %v894_v49 = vld [vmem:[%s1151_s15 + $0x54] ss:$8 sps:$4 sm:$0xff]   ;;  %v896_v50 = vld [vmem:[%s1151_s15 + $0x50] ss:$8 sps:$4 sm:$0xff]  }
  0x42   : > { %v897_v51 = vld [vmem:[%s1151_s15 + $0x64] ss:$8 sps:$4 sm:$0xff]   ;;  %v411_v52 = vld [vmem:[%s1141_s26] sm:$0xff]  ;;  %v899_v54 = vld [vmem:[%s1151_s15 + $0x60] ss:$8 sps:$4 sm:$0xff]   ;;  %p819_p13 = scmp.ne.s32.totalorder %s967_s14, 2 }
  0x43   : > { %v786_v53 = vcombine.high %v411_v52, %v411_v52  ;;  %v900_v55 = vld [vmem:[%s1151_s15 + $0x74] ss:$8 sps:$4 sm:$0xff]   ;;  %v902_v56 = vld [vmem:[%s1151_s15 + $0x70] ss:$8 sps:$4 sm:$0xff]   ;;  %v903_v57 = vld [vmem:[%s1151_s15 + $0x84] ss:$8 sps:$4 sm:$0xff]   ;;  %v785_v9 = vcombine.low %v411_v52, %v411_v52 }
  0x44   : > { %614 = vmatpush1.bf16.msra.mxu0 %v884_v42  ;;  %v905_v58 = vld [vmem:[%s1151_s15 + $0x80] ss:$8 sps:$4 sm:$0xff]   ;;  %v906_v59 = vld [vmem:[%s1151_s15 + $0x94] ss:$8 sps:$4 sm:$0xff]   ;;  %v908_v60 = vld [vmem:[%s1151_s15 + $0x90] ss:$8 sps:$4 sm:$0xff]  }
  0x45   : > { %615 = vmatprep.subr.bf16.mxu0 %v885_v43  ;;  %643 = vmatprep.mubr.bf16.mxu0 %v786_v53  ;;  %v909_v61 = vld [vmem:[%s1151_s15 + $0xa4] ss:$8 sps:$4 sm:$0xff]   ;;  %v911_v62 = vld [vmem:[%s1151_s15 + $0xa0] ss:$8 sps:$4 sm:$0xff]   ;;  %v912_v63 = vld [vmem:[%s1151_s15 + $0xb4] ss:$8 sps:$4 sm:$0xff]  }
  0x46   : > { %v914_v0 = vld [vmem:[%s1151_s15 + $0xb0] ss:$8 sps:$4 sm:$0xff]   ;;  %v915_v1 = vld [vmem:[%s1151_s15 + $0xc4] ss:$8 sps:$4 sm:$0xff]   ;;  %v917_v2 = vld [vmem:[%s1151_s15 + $0xc0] ss:$8 sps:$4 sm:$0xff]  }
  0x47   : > { %v918_v3 = vld [vmem:[%s1151_s15 + $0xd4] ss:$8 sps:$4 sm:$0xff]   ;;  %v920_v4 = vld [vmem:[%s1151_s15 + $0xd0] ss:$8 sps:$4 sm:$0xff]   ;;  %v921_v5 = vld [vmem:[%s1151_s15 + $0xe4] ss:$8 sps:$4 sm:$0xff]  }
  0x48   : > { %616 = vmatpush1.bf16.msra.mxu0 %v887_v44  ;;  %v923_v6 = vld [vmem:[%s1151_s15 + $0xe0] ss:$8 sps:$4 sm:$0xff]   ;;  %v924_v7 = vld [vmem:[%s1151_s15 + $0xf4] ss:$8 sps:$4 sm:$0xff]   ;;  %v926_v8 = vld [vmem:[%s1151_s15 + $0xf0] ss:$8 sps:$4 sm:$0xff]  }
  0x49   : > { %617 = vmatprep.subr.bf16.mxu0 %v888_v45  ;;  %v409_v10 = vld [vmem:[#allocation2] sm:$0xff]  ;;  %v410_v11 = vld [vmem:[#allocation2 + $0x8] sm:$0xff] }
  0x4c   : > { %618 = vmatpush1.bf16.msra.mxu0 %v890_v46 }
  0x4d   : > { %619 = vmatprep.subr.bf16.mxu0 %v891_v47 }
  0x50   : > { %620 = vmatpush1.bf16.msra.mxu0 %v893_v48 }
  0x51   : > { %621 = vmatprep.subr.bf16.mxu0 %v894_v49 }
  0x54   : > { %622 = vmatpush1.bf16.msra.mxu0 %v896_v50 }
  0x55   : > { %623 = vmatprep.subr.bf16.mxu0 %v897_v51 }
  0x58   : > { %624 = vmatpush1.bf16.msra.mxu0 %v899_v54 }
  0x59   : > { %625 = vmatprep.subr.bf16.mxu0 %v900_v55 }
  0x5c   : > { %626 = vmatpush1.bf16.msra.mxu0 %v902_v56 }
  0x5d   : > { %627 = vmatprep.subr.bf16.mxu0 %v903_v57 }
  0x60   : > { %628 = vmatpush1.bf16.msra.mxu0 %v905_v58 }
  0x61   : > { %629 = vmatprep.subr.bf16.mxu0 %v906_v59 }
  0x64   : > { %630 = vmatpush1.bf16.msra.mxu0 %v908_v60 }
  0x65   : > { %631 = vmatprep.subr.bf16.mxu0 %v909_v61 }
  0x68   : > { %632 = vmatpush1.bf16.msra.mxu0 %v911_v62 }
  0x69   : > { %633 = vmatprep.subr.bf16.mxu0 %v912_v63 }
  0x6c   : > { %634 = vmatpush1.bf16.msra.mxu0 %v914_v0 }
  0x6d   : > { %635 = vmatprep.subr.bf16.mxu0 %v915_v1 }
  0x70   : > { %636 = vmatpush1.bf16.msra.mxu0 %v917_v2 }
  0x71   : > { %637 = vmatprep.subr.bf16.mxu0 %v918_v3 }
  0x74   : > { %638 = vmatpush1.bf16.msra.mxu0 %v920_v4 }
  0x75   : > { %639 = vmatprep.subr.bf16.mxu0 %v921_v5 }
  0x78   : > { %640 = vmatpush1.bf16.msra.mxu0 %v923_v6 }
  0x79   : > { %641 = vmatprep.subr.bf16.mxu0 %v924_v7 }
  0x7c   : > { %642 = vmatpush1.bf16.msra.mxu0 %v926_v8 }
  0x7f   : > { %644 = vmatmul.mubr.bf16.vlgmr.msra.gmra.mrb[0].mxu0 %v785_v9 }
 0x150   : > { %659 = sbr.rel (%p819_p13) target bundleno = 354 (0x162), region = 78 }
 0x152   : > { %v645_v12 = vpop.f32.mrb[0].mxu0 }
 0x153   : > { %v652_v13 = vadd.f32 %v645_v12, %v409_v10  ;;  %v647_v14 = vpop.f32.mrb[1].mxu0 }
 0x154   : > { %v653_v15 = vadd.f32 %v647_v14, %v410_v11  ;;  %v649_v16 = vpop.f32.mrb[2].mxu0 }
 0x155   : > { %654 = vst [vmem:[#allocation2] sm:$0xff] %v652_v13  ;;  %v650_v17 = vpop.f32.mrb[3].mxu0 }
 0x156   : > { %655 = vst [vmem:[#allocation2 + $0x8] sm:$0xff] %v653_v15 }
 0x15c   : > { %v660_v18 = vld [vmem:[#allocation2] sm:$0xff] }
 0x15d   : > { %v661_v19 = vld [vmem:[#allocation2 + $0x8] sm:$0xff]  ;;  %vm662_vm0 = vcmp.gt.f32.partialorder %v660_v18, 0.0  ;;  %v664_v20 = vmul.f32 0.2, %v660_v18 }
 0x15e   : > { %vm663_vm1 = vcmp.gt.f32.partialorder %v661_v19, 0.0  ;;  %v665_v21 = vmul.f32 0.2, %v661_v19 }
 0x15f   : > { %v666_v22 = vsel %vm662_vm0, %v660_v18, %v664_v20 }
 0x160   : > { %v667_v23 = vsel %vm663_vm1, %v661_v19, %v665_v21  ;;  %668 = vst [vmem:[%s1149_s5] sm:$0xff] %v666_v22 }
 0x161   : > { %669 = vst [vmem:[%s1149_s5 + $0x8] sm:$0xff] %v667_v23 }
 0x162 PF: > { %s13_s18 = sadd.s32 1, %s983_s18   ;;  %s1215_s12 = smov %s963_s13 }
 0x163   : > { %p10_p0 = scmp.ge.s32.totalorder %s13_s18, 8   ;;  %s1216_s13 = smov %s1056_s25 }
 0x164   : > { %s1217_s14 = smov %s975_s16  ;;  %s1218_s15 = smov %s979_s17 }
 0x165   : > { %s1219_s16 = smov %s1222_s19  ;;  %s1220_s17 = smov %s1226_s20 }
 0x166   :  { %12 = sbr.rel (!%p10_p0) target bundleno = 4 (0x4), region = 119 }

// kernel: global_discriminator.3
= control target key start
LH: loop header
LB: loop body
LE: loop exit
PB: predicated region body
PF: predicated region fallthrough
CT: control target
= control target key end

     0   :  { %vm429_vm2 = vcmask 7168   ;;  %s1171_s1 = inlined_call_operand.vmem [shape: f32[512,256], index: 1, kind: input, shape index: {}]   ;;  %s1172_s0 = inlined_call_operand.vmem [shape: f32[8,512], index: 0, kind: input, shape index: {}]   ;;  %s1173_s3 = inlined_call_operand.vmem [shape: f32[256,1], index: 3, kind: input, shape index: {}]   ;;  %s1174_s2 = inlined_call_operand.vmem [shape: f32[1,256], index: 2, kind: input, shape index: {}]   ;;  %s1175_s4 = inlined_call_operand.<no memory space> [shape: f32[1,1], index: 4, kind: input, shape index: {}]   ;;  %s1176_s5 = inlined_call_operand.vmem [shape: f32[8,1], index: 5, kind: output, shape index: {}]  }
   0x1   :  { %v27_v0 = vld [vmem:[%s1171_s1 + $0x8] sm:$0xff]  ;;  %v29_v1 = vld [vmem:[%s1171_s1 + $0x18] sm:$0xff]  ;;  %v26_v2 = vld [vmem:[%s1171_s1] sm:$0xff] }
   0x2   :  { %v472_v3 = vpack.c.bf16 %v29_v1, %v27_v0  ;;  %v28_v4 = vld [vmem:[%s1171_s1 + $0x10] sm:$0xff]  ;;  %v91_v5 = vld [vmem:[%s1171_s1 + $0x208] sm:$0xff]  ;;  %v93_v6 = vld [vmem:[%s1171_s1 + $0x218] sm:$0xff] }
   0x3   :  { %v474_v7 = vpack.c.bf16 %v28_v4, %v26_v2  ;;  %v536_v8 = vpack.c.bf16 %v93_v6, %v91_v5  ;;  %v90_v9 = vld [vmem:[%s1171_s1 + $0x200] sm:$0xff]  ;;  %v92_v10 = vld [vmem:[%s1171_s1 + $0x210] sm:$0xff]  ;;  %v31_v11 = vld [vmem:[%s1171_s1 + $0x28] sm:$0xff] }
   0x4   :  { %473 = vmatprep.subr.bf16.mxu1 %v472_v3  ;;  %v538_v12 = vpack.c.bf16 %v92_v10, %v90_v9  ;;  %v33_v13 = vld [vmem:[%s1171_s1 + $0x38] sm:$0xff]  ;;  %v30_v14 = vld [vmem:[%s1171_s1 + $0x20] sm:$0xff]  ;;  %v32_v15 = vld [vmem:[%s1171_s1 + $0x30] sm:$0xff] }
   0x5   :  { %475 = vmatpush1.bf16.msra.mxu1 %v474_v7  ;;  %537 = vmatprep.subr.bf16.mxu0 %v536_v8  ;;  %v476_v16 = vpack.c.bf16 %v33_v13, %v31_v11  ;;  %v478_v17 = vpack.c.bf16 %v32_v15, %v30_v14  ;;  %v95_v18 = vld [vmem:[%s1171_s1 + $0x228] sm:$0xff]  ;;  %v97_v19 = vld [vmem:[%s1171_s1 + $0x238] sm:$0xff]  ;;  %v94_v20 = vld [vmem:[%s1171_s1 + $0x220] sm:$0xff] }
   0x6   :  { %539 = vmatpush1.bf16.msra.mxu0 %v538_v12  ;;  %v540_v21 = vpack.c.bf16 %v97_v19, %v95_v18  ;;  %v96_v22 = vld [vmem:[%s1171_s1 + $0x230] sm:$0xff]  ;;  %v35_v23 = vld [vmem:[%s1171_s1 + $0x48] sm:$0xff]  ;;  %v37_v24 = vld [vmem:[%s1171_s1 + $0x58] sm:$0xff] }
   0x7   :  { %477 = vmatprep.subr.bf16.mxu1 %v476_v16  ;;  %v542_v25 = vpack.c.bf16 %v96_v22, %v94_v20  ;;  %v480_v26 = vpack.c.bf16 %v37_v24, %v35_v23  ;;  %v34_v27 = vld [vmem:[%s1171_s1 + $0x40] sm:$0xff]  ;;  %v36_v28 = vld [vmem:[%s1171_s1 + $0x50] sm:$0xff]  ;;  %v99_v29 = vld [vmem:[%s1171_s1 + $0x248] sm:$0xff] }
   0x8   :  { %541 = vmatprep.subr.bf16.mxu0 %v540_v21  ;;  %v101_v30 = vld [vmem:[%s1171_s1 + $0x258] sm:$0xff]  ;;  %v98_v31 = vld [vmem:[%s1171_s1 + $0x240] sm:$0xff]  ;;  %v100_v32 = vld [vmem:[%s1171_s1 + $0x250] sm:$0xff]  ;;  %v482_v33 = vpack.c.bf16 %v36_v28, %v34_v27 }
   0x9   :  { %479 = vmatpush1.bf16.msra.mxu1 %v478_v17  ;;  %v544_v34 = vpack.c.bf16 %v101_v30, %v99_v29  ;;  %v39_v35 = vld [vmem:[%s1171_s1 + $0x68] sm:$0xff]  ;;  %v41_v36 = vld [vmem:[%s1171_s1 + $0x78] sm:$0xff]  ;;  %v38_v37 = vld [vmem:[%s1171_s1 + $0x60] sm:$0xff]  ;;  %v546_v38 = vpack.c.bf16 %v100_v32, %v98_v31 }
   0xa   :  { %543 = vmatpush1.bf16.msra.mxu0 %v542_v25  ;;  %481 = vmatprep.subr.bf16.mxu1 %v480_v26  ;;  %v484_v39 = vpack.c.bf16 %v41_v36, %v39_v35  ;;  %v40_v40 = vld [vmem:[%s1171_s1 + $0x70] sm:$0xff]  ;;  %v103_v41 = vld [vmem:[%s1171_s1 + $0x268] sm:$0xff]  ;;  %v105_v42 = vld [vmem:[%s1171_s1 + $0x278] sm:$0xff] }
   0xb   :  { %545 = vmatprep.subr.bf16.mxu0 %v544_v34  ;;  %v548_v43 = vpack.c.bf16 %v105_v42, %v103_v41  ;;  %v102_v44 = vld [vmem:[%s1171_s1 + $0x260] sm:$0xff]  ;;  %v104_v45 = vld [vmem:[%s1171_s1 + $0x270] sm:$0xff]  ;;  %v43_v46 = vld [vmem:[%s1171_s1 + $0x88] sm:$0xff]  ;;  %v486_v48 = vpack.c.bf16 %v40_v40, %v38_v37 }
   0xc   :  { %v45_v47 = vld [vmem:[%s1171_s1 + $0x98] sm:$0xff]  ;;  %v107_v49 = vld [vmem:[%s1171_s1 + $0x288] sm:$0xff]  ;;  %v550_v51 = vpack.c.bf16 %v104_v45, %v102_v44  ;;  %v42_v53 = vld [vmem:[%s1171_s1 + $0x80] sm:$0xff] }
   0xd   :  { %483 = vmatpush1.bf16.msra.mxu1 %v482_v33  ;;  %v109_v50 = vld [vmem:[%s1171_s1 + $0x298] sm:$0xff]  ;;  %v488_v52 = vpack.c.bf16 %v45_v47, %v43_v46  ;;  %v44_v54 = vld [vmem:[%s1171_s1 + $0x90] sm:$0xff]  ;;  %v106_v55 = vld [vmem:[%s1171_s1 + $0x280] sm:$0xff] }
   0xe   :  { %547 = vmatpush1.bf16.msra.mxu0 %v546_v38  ;;  %485 = vmatprep.subr.bf16.mxu1 %v484_v39  ;;  %v552_v56 = vpack.c.bf16 %v109_v50, %v107_v49  ;;  %v108_v57 = vld [vmem:[%s1171_s1 + $0x290] sm:$0xff]  ;;  %v47_v58 = vld [vmem:[%s1171_s1 + $0xa8] sm:$0xff]  ;;  %v49_v59 = vld [vmem:[%s1171_s1 + $0xb8] sm:$0xff]  ;;  %v490_v62 = vpack.c.bf16 %v44_v54, %v42_v53 }
   0xf   :  { %549 = vmatprep.subr.bf16.mxu0 %v548_v43  ;;  %v111_v60 = vld [vmem:[%s1171_s1 + $0x2a8] sm:$0xff]  ;;  %v113_v61 = vld [vmem:[%s1171_s1 + $0x2b8] sm:$0xff]  ;;  %v554_v63 = vpack.c.bf16 %v108_v57, %v106_v55  ;;  %v492_v0 = vpack.c.bf16 %v49_v59, %v47_v58  ;;  %v46_v1 = vld [vmem:[%s1171_s1 + $0xa0] sm:$0xff] }
  0x10   :  { %v48_v2 = vld [vmem:[%s1171_s1 + $0xb0] sm:$0xff]  ;;  %v110_v3 = vld [vmem:[%s1171_s1 + $0x2a0] sm:$0xff]  ;;  %v556_v4 = vpack.c.bf16 %v113_v61, %v111_v60  ;;  %v51_v6 = vld [vmem:[%s1171_s1 + $0xc8] sm:$0xff] }
  0x11   :  { %487 = vmatpush1.bf16.msra.mxu1 %v486_v48  ;;  %v112_v5 = vld [vmem:[%s1171_s1 + $0x2b0] sm:$0xff]  ;;  %v53_v7 = vld [vmem:[%s1171_s1 + $0xd8] sm:$0xff]  ;;  %v115_v8 = vld [vmem:[%s1171_s1 + $0x2c8] sm:$0xff]  ;;  %v494_v10 = vpack.c.bf16 %v48_v2, %v46_v1 }
  0x12   :  { %551 = vmatpush1.bf16.msra.mxu0 %v550_v51  ;;  %489 = vmatprep.subr.bf16.mxu1 %v488_v52  ;;  %v117_v9 = vld [vmem:[%s1171_s1 + $0x2d8] sm:$0xff]  ;;  %v558_v11 = vpack.c.bf16 %v112_v5, %v110_v3  ;;  %v496_v12 = vpack.c.bf16 %v53_v7, %v51_v6  ;;  %v50_v13 = vld [vmem:[%s1171_s1 + $0xc0] sm:$0xff]  ;;  %v52_v14 = vld [vmem:[%s1171_s1 + $0xd0] sm:$0xff] }
  0x13   :  { %553 = vmatprep.subr.bf16.mxu0 %v552_v56  ;;  %v114_v15 = vld [vmem:[%s1171_s1 + $0x2c0] sm:$0xff]  ;;  %v560_v16 = vpack.c.bf16 %v117_v9, %v115_v8  ;;  %v116_v17 = vld [vmem:[%s1171_s1 + $0x2d0] sm:$0xff]  ;;  %v55_v18 = vld [vmem:[%s1171_s1 + $0xe8] sm:$0xff]  ;;  %v498_v22 = vpack.c.bf16 %v52_v14, %v50_v13 }
  0x14   :  { %v57_v19 = vld [vmem:[%s1171_s1 + $0xf8] sm:$0xff]  ;;  %v119_v20 = vld [vmem:[%s1171_s1 + $0x2e8] sm:$0xff]  ;;  %v562_v23 = vpack.c.bf16 %v116_v17, %v114_v15  ;;  %v54_v25 = vld [vmem:[%s1171_s1 + $0xe0] sm:$0xff] }
  0x15   :  { %491 = vmatpush1.bf16.msra.mxu1 %v490_v62  ;;  %v121_v21 = vld [vmem:[%s1171_s1 + $0x2f8] sm:$0xff]  ;;  %v500_v24 = vpack.c.bf16 %v57_v19, %v55_v18  ;;  %v56_v26 = vld [vmem:[%s1171_s1 + $0xf0] sm:$0xff]  ;;  %v118_v27 = vld [vmem:[%s1171_s1 + $0x2e0] sm:$0xff] }
  0x16   :  { %555 = vmatpush1.bf16.msra.mxu0 %v554_v63  ;;  %493 = vmatprep.subr.bf16.mxu1 %v492_v0  ;;  %v564_v28 = vpack.c.bf16 %v121_v21, %v119_v20  ;;  %v120_v29 = vld [vmem:[%s1171_s1 + $0x2f0] sm:$0xff]  ;;  %v59_v30 = vld [vmem:[%s1171_s1 + $0x108] sm:$0xff]  ;;  %v61_v31 = vld [vmem:[%s1171_s1 + $0x118] sm:$0xff]  ;;  %v502_v34 = vpack.c.bf16 %v56_v26, %v54_v25 }
  0x17   :  { %557 = vmatprep.subr.bf16.mxu0 %v556_v4  ;;  %v123_v32 = vld [vmem:[%s1171_s1 + $0x308] sm:$0xff]  ;;  %v125_v33 = vld [vmem:[%s1171_s1 + $0x318] sm:$0xff]  ;;  %v566_v35 = vpack.c.bf16 %v120_v29, %v118_v27  ;;  %v504_v36 = vpack.c.bf16 %v61_v31, %v59_v30  ;;  %v58_v37 = vld [vmem:[%s1171_s1 + $0x100] sm:$0xff] }
  0x18   :  { %v60_v38 = vld [vmem:[%s1171_s1 + $0x110] sm:$0xff]  ;;  %v122_v39 = vld [vmem:[%s1171_s1 + $0x300] sm:$0xff]  ;;  %v568_v40 = vpack.c.bf16 %v125_v33, %v123_v32  ;;  %v63_v42 = vld [vmem:[%s1171_s1 + $0x128] sm:$0xff] }
  0x19   :  { %495 = vmatpush1.bf16.msra.mxu1 %v494_v10  ;;  %v124_v41 = vld [vmem:[%s1171_s1 + $0x310] sm:$0xff]  ;;  %v65_v43 = vld [vmem:[%s1171_s1 + $0x138] sm:$0xff]  ;;  %v127_v44 = vld [vmem:[%s1171_s1 + $0x328] sm:$0xff]  ;;  %v506_v46 = vpack.c.bf16 %v60_v38, %v58_v37 }
  0x1a   :  { %559 = vmatpush1.bf16.msra.mxu0 %v558_v11  ;;  %497 = vmatprep.subr.bf16.mxu1 %v496_v12  ;;  %v129_v45 = vld [vmem:[%s1171_s1 + $0x338] sm:$0xff]  ;;  %v570_v47 = vpack.c.bf16 %v124_v41, %v122_v39  ;;  %v508_v48 = vpack.c.bf16 %v65_v43, %v63_v42  ;;  %v62_v49 = vld [vmem:[%s1171_s1 + $0x120] sm:$0xff]  ;;  %v64_v50 = vld [vmem:[%s1171_s1 + $0x130] sm:$0xff] }
  0x1b   :  { %561 = vmatprep.subr.bf16.mxu0 %v560_v16  ;;  %v126_v51 = vld [vmem:[%s1171_s1 + $0x320] sm:$0xff]  ;;  %v572_v52 = vpack.c.bf16 %v129_v45, %v127_v44  ;;  %v128_v53 = vld [vmem:[%s1171_s1 + $0x330] sm:$0xff]  ;;  %v67_v54 = vld [vmem:[%s1171_s1 + $0x148] sm:$0xff]  ;;  %v510_v58 = vpack.c.bf16 %v64_v50, %v62_v49 }
  0x1c   :  { %v69_v55 = vld [vmem:[%s1171_s1 + $0x158] sm:$0xff]  ;;  %v131_v56 = vld [vmem:[%s1171_s1 + $0x348] sm:$0xff]  ;;  %v574_v59 = vpack.c.bf16 %v128_v53, %v126_v51  ;;  %v66_v61 = vld [vmem:[%s1171_s1 + $0x140] sm:$0xff] }
  0x1d   :  { %499 = vmatpush1.bf16.msra.mxu1 %v498_v22  ;;  %v133_v57 = vld [vmem:[%s1171_s1 + $0x358] sm:$0xff]  ;;  %v512_v60 = vpack.c.bf16 %v69_v55, %v67_v54  ;;  %v68_v62 = vld [vmem:[%s1171_s1 + $0x150] sm:$0xff]  ;;  %v130_v63 = vld [vmem:[%s1171_s1 + $0x340] sm:$0xff] }
  0x1e   :  { %563 = vmatpush1.bf16.msra.mxu0 %v562_v23  ;;  %501 = vmatprep.subr.bf16.mxu1 %v500_v24  ;;  %v576_v0 = vpack.c.bf16 %v133_v57, %v131_v56  ;;  %v132_v1 = vld [vmem:[%s1171_s1 + $0x350] sm:$0xff]  ;;  %v71_v2 = vld [vmem:[%s1171_s1 + $0x168] sm:$0xff]  ;;  %v73_v3 = vld [vmem:[%s1171_s1 + $0x178] sm:$0xff]  ;;  %v514_v6 = vpack.c.bf16 %v68_v62, %v66_v61 }
  0x1f   :  { %565 = vmatprep.subr.bf16.mxu0 %v564_v28  ;;  %v135_v4 = vld [vmem:[%s1171_s1 + $0x368] sm:$0xff]  ;;  %v137_v5 = vld [vmem:[%s1171_s1 + $0x378] sm:$0xff]  ;;  %v70_v7 = vld [vmem:[%s1171_s1 + $0x160] sm:$0xff]  ;;  %v578_v8 = vpack.c.bf16 %v132_v1, %v130_v63  ;;  %v516_v9 = vpack.c.bf16 %v73_v3, %v71_v2 }
  0x20   :  { %v72_v10 = vld [vmem:[%s1171_s1 + $0x170] sm:$0xff]  ;;  %v134_v11 = vld [vmem:[%s1171_s1 + $0x360] sm:$0xff]  ;;  %v580_v13 = vpack.c.bf16 %v137_v5, %v135_v4  ;;  %v75_v14 = vld [vmem:[%s1171_s1 + $0x188] sm:$0xff] }
  0x21   :  { %503 = vmatpush1.bf16.msra.mxu1 %v502_v34  ;;  %v136_v12 = vld [vmem:[%s1171_s1 + $0x370] sm:$0xff]  ;;  %v77_v15 = vld [vmem:[%s1171_s1 + $0x198] sm:$0xff]  ;;  %v23_v16 = vld [vmem:[%s1172_s0 + $0x8] sm:$0xff]  ;;  %v518_v20 = vpack.c.bf16 %v72_v10, %v70_v7 }
  0x22   :  { %567 = vmatpush1.bf16.msra.mxu0 %v566_v35  ;;  %505 = vmatprep.subr.bf16.mxu1 %v504_v36  ;;  %v139_v17 = vld [vmem:[%s1171_s1 + $0x388] sm:$0xff]  ;;  %v141_v18 = vld [vmem:[%s1171_s1 + $0x398] sm:$0xff]  ;;  %v582_v21 = vpack.c.bf16 %v136_v12, %v134_v11  ;;  %v520_v22 = vpack.c.bf16 %v77_v15, %v75_v14  ;;  %v74_v23 = vld [vmem:[%s1171_s1 + $0x180] sm:$0xff] }
  0x23   :  { %569 = vmatprep.subr.bf16.mxu0 %v568_v40  ;;  %230 = vmatprep.mubr.f32.mxu1 %v23_v16  ;;  %v25_v19 = vld [vmem:[%s1172_s0 + $0x18] sm:$0xff]  ;;  %v76_v24 = vld [vmem:[%s1171_s1 + $0x190] sm:$0xff]  ;;  %v138_v25 = vld [vmem:[%s1171_s1 + $0x380] sm:$0xff]  ;;  %v584_v26 = vpack.c.bf16 %v141_v18, %v139_v17 }
  0x24   :  { %301 = vmatprep.mubr.f32.mxu0 %v25_v19  ;;  %v140_v27 = vld [vmem:[%s1171_s1 + $0x390] sm:$0xff]  ;;  %v79_v28 = vld [vmem:[%s1171_s1 + $0x1a8] sm:$0xff]  ;;  %v81_v29 = vld [vmem:[%s1171_s1 + $0x1b8] sm:$0xff]  ;;  %v522_v32 = vpack.c.bf16 %v76_v24, %v74_v23 }
  0x25   :  { %507 = vmatpush1.bf16.msra.mxu1 %v506_v46  ;;  %v143_v30 = vld [vmem:[%s1171_s1 + $0x3a8] sm:$0xff]  ;;  %v145_v31 = vld [vmem:[%s1171_s1 + $0x3b8] sm:$0xff]  ;;  %v586_v33 = vpack.c.bf16 %v140_v27, %v138_v25  ;;  %v524_v34 = vpack.c.bf16 %v81_v29, %v79_v28  ;;  %v78_v35 = vld [vmem:[%s1171_s1 + $0x1a0] sm:$0xff] }
  0x26   :  { %571 = vmatpush1.bf16.msra.mxu0 %v570_v47  ;;  %509 = vmatprep.subr.bf16.mxu1 %v508_v48  ;;  %v80_v36 = vld [vmem:[%s1171_s1 + $0x1b0] sm:$0xff]  ;;  %v142_v37 = vld [vmem:[%s1171_s1 + $0x3a0] sm:$0xff]  ;;  %v588_v38 = vpack.c.bf16 %v145_v31, %v143_v30  ;;  %v83_v40 = vld [vmem:[%s1171_s1 + $0x1c8] sm:$0xff] }
  0x27   :  { %573 = vmatprep.subr.bf16.mxu0 %v572_v52  ;;  %v144_v39 = vld [vmem:[%s1171_s1 + $0x3b0] sm:$0xff]  ;;  %v85_v41 = vld [vmem:[%s1171_s1 + $0x1d8] sm:$0xff]  ;;  %v147_v42 = vld [vmem:[%s1171_s1 + $0x3c8] sm:$0xff]  ;;  %v526_v44 = vpack.c.bf16 %v80_v36, %v78_v35 }
  0x28   :  { %v149_v43 = vld [vmem:[%s1171_s1 + $0x3d8] sm:$0xff]  ;;  %v590_v45 = vpack.c.bf16 %v144_v39, %v142_v37  ;;  %v528_v46 = vpack.c.bf16 %v85_v41, %v83_v40  ;;  %v82_v47 = vld [vmem:[%s1171_s1 + $0x1c0] sm:$0xff]  ;;  %v84_v48 = vld [vmem:[%s1171_s1 + $0x1d0] sm:$0xff] }
  0x29   :  { %511 = vmatpush1.bf16.msra.mxu1 %v510_v58  ;;  %v146_v49 = vld [vmem:[%s1171_s1 + $0x3c0] sm:$0xff]  ;;  %v592_v50 = vpack.c.bf16 %v149_v43, %v147_v42  ;;  %v148_v51 = vld [vmem:[%s1171_s1 + $0x3d0] sm:$0xff]  ;;  %v87_v52 = vld [vmem:[%s1171_s1 + $0x1e8] sm:$0xff]  ;;  %v530_v56 = vpack.c.bf16 %v84_v48, %v82_v47 }
  0x2a   :  { %575 = vmatpush1.bf16.msra.mxu0 %v574_v59  ;;  %513 = vmatprep.subr.bf16.mxu1 %v512_v60  ;;  %v89_v53 = vld [vmem:[%s1171_s1 + $0x1f8] sm:$0xff]  ;;  %v151_v54 = vld [vmem:[%s1171_s1 + $0x3e8] sm:$0xff]  ;;  %v594_v57 = vpack.c.bf16 %v148_v51, %v146_v49  ;;  %v86_v59 = vld [vmem:[%s1171_s1 + $0x1e0] sm:$0xff] }
  0x2b   :  { %577 = vmatprep.subr.bf16.mxu0 %v576_v0  ;;  %v153_v55 = vld [vmem:[%s1171_s1 + $0x3f8] sm:$0xff]  ;;  %v532_v58 = vpack.c.bf16 %v89_v53, %v87_v52  ;;  %v88_v60 = vld [vmem:[%s1171_s1 + $0x1f0] sm:$0xff]  ;;  %v150_v61 = vld [vmem:[%s1171_s1 + $0x3e0] sm:$0xff]  ;;  %v156_v52 = vlaneseq }
  0x2c   :  { %v596_v62 = vpack.c.bf16 %v153_v55, %v151_v54  ;;  %v152_v63 = vld [vmem:[%s1171_s1 + $0x3f0] sm:$0xff]  ;;  %v330_v0 = vld [vmem:[%s1173_s3 + $0x80] sm:$0xff]  ;;  %v331_v1 = vld [vmem:[%s1173_s3 + $0x88] sm:$0xff]  ;;  %v534_v2 = vpack.c.bf16 %v88_v60, %v86_v59 }
  0x2d   :  { %515 = vmatpush1.bf16.msra.mxu1 %v514_v6  ;;  %v598_v3 = vpack.c.bf16 %v152_v63, %v150_v61  ;;  %v600_v4 = vpack.c.bf16 %v331_v1, %v330_v0  ;;  %v314_v5 = vld [vmem:[%s1173_s3] sm:$0xff]  ;;  %v315_v6 = vld [vmem:[%s1173_s3 + $0x8] sm:$0xff]  ;;  %v332_v7 = vld [vmem:[%s1173_s3 + $0x90] sm:$0xff]  ;;  %v157_v53 = vshrl.u32 %v156_v52, 7 }
  0x2e   :  { %579 = vmatpush1.bf16.msra.mxu0 %v578_v8  ;;  %517 = vmatprep.subr.bf16.mxu1 %v516_v9  ;;  %v333_v8 = vld [vmem:[%s1173_s3 + $0x98] sm:$0xff]  ;;  %v22_v9 = vld [vmem:[%s1172_s0] sm:$0xff]  ;;  %v602_v10 = vpack.c.bf16 %v315_v6, %v314_v5  ;;  %v24_v11 = vld [vmem:[%s1172_s0 + $0x10] sm:$0xff] }
  0x2f   :  { %581 = vmatprep.subr.bf16.mxu0 %v580_v13  ;;  %v604_v12 = vpack.c.bf16 %v333_v8, %v332_v7  ;;  %v316_v13 = vld [vmem:[%s1173_s3 + $0x10] sm:$0xff]  ;;  %v317_v14 = vld [vmem:[%s1173_s3 + $0x18] sm:$0xff]  ;;  %v334_v15 = vld [vmem:[%s1173_s3 + $0xa0] sm:$0xff]  ;;  %v158_v54 = vsub.s32 0, %v157_v53  ;;  %v10_v7 = vstv %s1175_s4 }
  0x30   :  { %v335_v16 = vld [vmem:[%s1173_s3 + $0xa8] sm:$0xff]  ;;  %v606_v17 = vpack.c.bf16 %v317_v14, %v316_v13  ;;  %v318_v19 = vld [vmem:[%s1173_s3 + $0x20] sm:$0xff]  ;;  %v320_v25 = vld [vmem:[%s1173_s3 + $0x30] sm:$0xff]  ;;  %11 = vst [vmem:[#allocation2] sm:$0x1] %v10_v7 }
  0x31   :  { %519 = vmatpush1.bf16.msra.mxu1 %v518_v20  ;;  %v608_v18 = vpack.c.bf16 %v335_v16, %v334_v15  ;;  %v319_v20 = vld [vmem:[%s1173_s3 + $0x28] sm:$0xff]  ;;  %v338_v27 = vld [vmem:[%s1173_s3 + $0xc0] sm:$0xff]  ;;  %v324_v37 = vld [vmem:[%s1173_s3 + $0x50] sm:$0xff] }
  0x32   :  { %583 = vmatpush1.bf16.msra.mxu0 %v582_v21  ;;  %521 = vmatprep.subr.bf16.mxu1 %v520_v22  ;;  %v336_v21 = vld [vmem:[%s1173_s3 + $0xb0] sm:$0xff]  ;;  %v337_v22 = vld [vmem:[%s1173_s3 + $0xb8] sm:$0xff]  ;;  %v610_v23 = vpack.c.bf16 %v319_v20, %v318_v19  ;;  %v339_v28 = vld [vmem:[%s1173_s3 + $0xc8] sm:$0xff] }
  0x33   :  { %585 = vmatprep.subr.bf16.mxu0 %v584_v26  ;;  %v612_v24 = vpack.c.bf16 %v337_v22, %v336_v21  ;;  %v321_v26 = vld [vmem:[%s1173_s3 + $0x38] sm:$0xff]  ;;  %v616_v30 = vpack.c.bf16 %v339_v28, %v338_v27  ;;  %v322_v31 = vld [vmem:[%s1173_s3 + $0x40] sm:$0xff]  ;;  %v343_v41 = vld [vmem:[%s1173_s3 + $0xe8] sm:$0xff] }
  0x34   :  { %v614_v29 = vpack.c.bf16 %v321_v26, %v320_v25  ;;  %v342_v40 = vld [vmem:[%s1173_s3 + $0xe0] sm:$0xff]  ;;  %v345_v47 = vld [vmem:[%s1173_s3 + $0xf8] sm:$0xff]  ;;  %v328_v49 = vld [vmem:[%s1173_s3 + $0x70] sm:$0xff] }
  0x35   :  { %523 = vmatpush1.bf16.msra.mxu1 %v522_v32  ;;  %v323_v32 = vld [vmem:[%s1173_s3 + $0x48] sm:$0xff]  ;;  %v624_v42 = vpack.c.bf16 %v343_v41, %v342_v40  ;;  %v326_v43 = vld [vmem:[%s1173_s3 + $0x60] sm:$0xff] }
  0x36   :  { %587 = vmatpush1.bf16.msra.mxu0 %v586_v33  ;;  %525 = vmatprep.subr.bf16.mxu1 %v524_v34  ;;  %v340_v33 = vld [vmem:[%s1173_s3 + $0xd0] sm:$0xff]  ;;  %v341_v34 = vld [vmem:[%s1173_s3 + $0xd8] sm:$0xff]  ;;  %v618_v35 = vpack.c.bf16 %v323_v32, %v322_v31  ;;  %v154_v55 = vld [vmem:[%s1174_s2] sm:$0x3] }
  0x37   :  { %589 = vmatprep.subr.bf16.mxu0 %v588_v38  ;;  %v620_v36 = vpack.c.bf16 %v341_v34, %v340_v33  ;;  %v325_v38 = vld [vmem:[%s1173_s3 + $0x58] sm:$0xff] }
  0x38   :  { %v622_v39 = vpack.c.bf16 %v325_v38, %v324_v37 }
  0x39   :  { %527 = vmatpush1.bf16.msra.mxu1 %v526_v44  ;;  %v327_v44 = vld [vmem:[%s1173_s3 + $0x68] sm:$0xff] }
  0x3a   :  { %591 = vmatpush1.bf16.msra.mxu0 %v590_v45  ;;  %529 = vmatprep.subr.bf16.mxu1 %v528_v46  ;;  %v626_v45 = vpack.c.bf16 %v327_v44, %v326_v43  ;;  %v344_v46 = vld [vmem:[%s1173_s3 + $0xf0] sm:$0xff] }
  0x3b   :  { %593 = vmatprep.subr.bf16.mxu0 %v592_v50  ;;  %v628_v48 = vpack.c.bf16 %v345_v47, %v344_v46  ;;  %v329_v50 = vld [vmem:[%s1173_s3 + $0x78] sm:$0xff] }
  0x3c   :  { %v630_v51 = vpack.c.bf16 %v329_v50, %v328_v49 }
  0x3d   :  { %531 = vmatpush1.bf16.msra.mxu1 %v530_v56  ;;  %v162_v56 = vsub.s32 1, %v157_v53 }
  0x3e   :  { %595 = vmatpush1.bf16.msra.mxu0 %v594_v57  ;;  %533 = vmatprep.subr.bf16.mxu1 %v532_v58  ;;  %v159_v57 = vrot.slane %v154_v55, %v158_v54 }
  0x3f   :  { %597 = vmatprep.subr.bf16.mxu0 %v596_v62  ;;  %v163_v58 = vrot.slane %v154_v55, %v162_v56 }
  0x41   :  { %535 = vmatpush1.bf16.msra.mxu1 %v534_v2 }
  0x42   :  { %599 = vmatpush1.bf16.msra.mxu0 %v598_v3  ;;  %601 = vmatprep.subr.bf16.mxu1 %v600_v4 }
  0x44   :  { %231 = vmatmul.mubr.f32.vlgmr.msra.gmra.mrb[0].mxu1 %v22_v9  ;;  %v435_v9 = vld [vmem:[#allocation2] ss:$0 sm:$0xff] }
  0x45   :  { %302 = vmatmul.mubr.f32.vlgmr.msra.gmra.mrb[0].mxu0 %v24_v11  ;;  %603 = vmatpush3.bf16.msra.mxu1 %v602_v10 }
  0x46   :  { %605 = vmatprep.subr.bf16.mxu1 %v604_v12 }
  0x49   :  { %607 = vmatpush3.bf16.msra.mxu1 %v606_v17 }
  0x4a   :  { %609 = vmatprep.subr.bf16.mxu1 %v608_v18 }
  0x4d   :  { %611 = vmatpush3.bf16.msra.mxu1 %v610_v23 }
  0x4e   :  { %613 = vmatprep.subr.bf16.mxu1 %v612_v24 }
  0x51   :  { %615 = vmatpush3.bf16.msra.mxu1 %v614_v29 }
  0x52   :  { %617 = vmatprep.subr.bf16.mxu1 %v616_v30 }
  0x55   :  { %619 = vmatpush3.bf16.msra.mxu1 %v618_v35 }
  0x56   :  { %621 = vmatprep.subr.bf16.mxu1 %v620_v36 }
  0x59   :  { %623 = vmatpush3.bf16.msra.mxu1 %v622_v39 }
  0x5a   :  { %625 = vmatprep.subr.bf16.mxu1 %v624_v42 }
  0x5d   :  { %627 = vmatpush3.bf16.msra.mxu1 %v626_v45 }
  0x5e   :  { %629 = vmatprep.subr.bf16.mxu1 %v628_v48 }
  0x61   :  { %631 = vmatpush3.bf16.msra.mxu1 %v630_v51 }
 0x117   :  { %v232_v59 = vpop.f32.mrb[0].mxu1 }
 0x118   :  { %v233_v60 = vadd.f32 %v232_v59, %v159_v57  ;;  %v234_v61 = vpop.f32.mrb[1].mxu1  ;;  %v303_v62 = vpop.f32.mrb[0].mxu0 }
 0x119   :  { %v235_v63 = vadd.f32 %v234_v61, %v163_v58  ;;  %v305_v0 = vpop.f32.mrb[1].mxu0 }
 0x11a   :  { %v304_v1 = vadd.f32 %v303_v62, %v233_v60 }
 0x11b   :  { %v306_v2 = vadd.f32 %v305_v0, %v235_v63 }
 0x11c   :  { %v310_v3 = vmul.f32 0.2, %v304_v1  ;;  %vm308_vm0 = vcmp.gt.f32.partialorder %v304_v1, 0.0 }
 0x11d   :  { %v311_v4 = vmul.f32 0.2, %v306_v2  ;;  %vm309_vm1 = vcmp.gt.f32.partialorder %v306_v2, 0.0 }
 0x11e   :  { %v312_v6 = vsel %vm308_vm0, %v304_v1, %v310_v3 }
 0x11f   :  { %v313_v5 = vsel %vm309_vm1, %v306_v2, %v311_v4 }
 0x120   :  { %417 = vmatprep.mubr.f32.mxu1 %v313_v5 }
 0x121   :  { %418 = vmatmul.mubr.f32.vlgmr.msra.gmra.mrb[2].mxu1 %v312_v6 }
 0x1f4   :  { %v469_v8 = vpop.f32.mrb[2].mxu1 }
 0x1f5   :  { %v470_v10 = vpop.f32.mrb[3].mxu1 }
 0x1f6   :  { %v471_v11 = vadd.f32 %v470_v10, %v469_v8 }
 0x1f8   :  { %v420_v12 = vadd.f32 %v471_v11, %v435_v9 }
 0x1fa   :  { %v436_v13 = vmul.f32 -1.442695, %v420_v12 }
 0x1fc   :  { %636 = vpow2.f32 %v436_v13 }
 0x206   :  { %v637_v14 = vpop.eup %636 }
 0x207   :  { %v426_v15 = vadd.f32 1.0, %v637_v14 }
 0x209   :  { %638 = vrcp.f32 %v426_v15 }
 0x213   :  { %v639_v16 = vpop.eup %638 }
 0x214   :  { %430 = vst.msk [vmem:[%s1176_s5] sm:$0xff] %vm429_vm2, %v639_v16 }

</bundles_post_ra>
